<compile_context>
chip_gen: v7x
topology: tpu7x:2x2x1
jax: 0.10.0
libtpu: 0.0.40
codegen_flags: <defaults>
</compile_context>

<pallas_src>
import jax
import jax.numpy as jnp
from jax.experimental import pallas as pl
from jax.experimental.pallas import tpu as pltpu


# ---------------------------------------------------------------------------
# Kernel: one (batch, column-tile) grid cell of the conv-as-matmul.
#   w1_ref      : (dim, Kp)           flattened conv weight (VMEM-resident)
#   bias_ref    : (1, dim, 1)         per-batch bias column (time emb + biases, f32)
#   patches_ref : (1, Kp, tile_cols)  flattened patches for this tile
#   out_ref     : (1, dim, tile_cols)
# ---------------------------------------------------------------------------
def _patch_embed_kernel(w1_ref, bias_ref, patches_ref, out_ref):
    acc = jnp.dot(w1_ref[...], patches_ref[0],
                  preferred_element_type=jnp.float32)        # (dim, tile_cols) f32
    out_ref[0] = (acc + bias_ref[0]).astype(out_ref.dtype)   # bias broadcasts over lanes


def _pick_col_tile(n_patches, dim, k_pad, batch, out_itemsize, in_itemsize):
    """Column-tile width for the (dim, Kp) @ (Kp, Np) matmul.

    Multiples of 128 (lane-dense stores), as large as possible up to 2048 to amortize
    the ~0.35 us/step grid overhead, gated by a VMEM budget that keeps the
    double-buffered pipeline well inside every generation's VMEM, and -- when B == 1
    -- small enough that the column axis yields >= 2 grid cells (v7x has 2 TCs).
    """
    if n_patches <= 128:
        return n_patches  # lane dim == full array dim (allowed); tiny problem anyway

    budget = 20 * 1024 * 1024  # conservative live-bytes budget per grid step

    def vmem_need(t):
        return (2 * k_pad * t * in_itemsize        # patches tile, double-buffered
                + 2 * dim * t * out_itemsize       # output tile, double-buffered
                + 2 * dim * k_pad * in_itemsize    # conv weight (constant index_map)
                + 64 * 1024)                       # bias + layout-padding slack

    t = min(2048, (n_patches // 128) * 128)
    if batch == 1:
        while t > 128 and pl.cdiv(n_patches, t) < 2:
            t -= 128
    while t > 128 and vmem_need(t) > budget:
        t -= 128
    return t


def patch_embedding_forward(x, t, conv_w, conv_b, lin_w, lin_b, patch_size,
                            *, matmul_dtype=jnp.bfloat16, out_dtype=None):
    """x: (B, C, H, W) NCHW; t: (B, emb_dim). Returns (B, dim, Hp, Wp)."""
    B, C, H, W = x.shape
    p = patch_size
    assert H % p == 0 and W % p == 0, "H and W must be divisible by patch_size"
    Hp, Wp = H // p, W // p
    Np = Hp * Wp
    dim = conv_w.shape[0]
    K = C * p * p
    out_dtype = x.dtype if out_dtype is None else out_dtype

    in_b = jnp.dtype(matmul_dtype).itemsize
    out_b = jnp.dtype(out_dtype).itemsize

    # --- per-batch bias: SiLU(t) @ lin_w.T + lin_b + conv_b.  Micro-FLOPs -> plain
    # jnp, XLA fuses it; no dedicated custom call / HBM round trip.
    bias = (jax.nn.silu(t.astype(jnp.float32)) @ lin_w.astype(jnp.float32).T
            + lin_b.astype(jnp.float32) + conv_b.astype(jnp.float32))       # (B, dim)
    bias = bias.reshape(B, dim, 1)                                          # column per batch

    # --- im2col: (B, K, Np) with K ordered (C, kh, kw) -- one XLA copy-fusion
    # (reshape + transpose + pad + cast in a single pass over x).
    patches = x.reshape(B, C, Hp, p, Wp, p)
    patches = patches.transpose(0, 1, 3, 5, 2, 4)                           # (B, C, p, p, Hp, Wp)
    patches = patches.reshape(B, K, Np)
    w1 = conv_w.reshape(dim, K)                                             # torch flatten order

    # Pad the contraction dim so sub-32-bit operands pack whole sublanes (8*itemratio).
    k_align = 16 if in_b == 2 else 8
    Kp = ((K + k_align - 1) // k_align) * k_align
    if Kp != K:
        patches = jnp.pad(patches, ((0, 0), (0, Kp - K), (0, 0)))
        w1 = jnp.pad(w1, ((0, 0), (0, Kp - K)))
    patches = patches.astype(matmul_dtype)
    w1 = w1.astype(matmul_dtype)

    # --- tiling: cdiv grid over columns, Pallas masks the ragged tail.
    tile_cols = _pick_col_tile(Np, dim, Kp, B, out_b, in_b)
    n_tiles = pl.cdiv(Np, tile_cols)

    need = (2 * Kp * tile_cols * in_b + 2 * dim * tile_cols * out_b
            + 2 * dim * Kp * in_b + 64 * 1024)
    vmem_limit = int(min(48 * 2**20, max(32 * 2**20, 2 * need)))

    out = pl.pallas_call(
        _patch_embed_kernel,
        out_shape=jax.ShapeDtypeStruct((B, dim, Np), out_dtype),
        grid_spec=pltpu.PrefetchScalarGridSpec(
            num_scalar_prefetch=0,
            grid=(B, n_tiles),
            in_specs=[
                pl.BlockSpec((dim, Kp), lambda b, j: (0, 0)),            # weight: resident
                pl.BlockSpec((1, dim, 1), lambda b, j: (b, 0, 0)),       # per-batch bias
                pl.BlockSpec((1, Kp, tile_cols), lambda b, j: (b, 0, j)),
            ],
            out_specs=pl.BlockSpec((1, dim, tile_cols), lambda b, j: (b, 0, j)),
        ),
        compiler_params=pltpu.CompilerParams(
            # both axes independent -> shard across TensorCores (v7x: 2 TCs)
            dimension_semantics=("parallel", "parallel"),
            vmem_limit_bytes=vmem_limit),
    )(w1, bias, patches)

    # (B, dim, Np) is contiguous with (B, dim, Hp, Wp): reshape is free, no HBM transpose.
    return out.reshape(B, dim, Hp, Wp)


def _reference_forward(x, t, conv_w, conv_b, lin_w, lin_b, patch_size):
    """Pure-JAX f32 reference replicating the PyTorch module."""
    conv_out = jax.lax.conv_general_dilated(
        x, conv_w, window_strides=(patch_size, patch_size), padding="VALID",
        dimension_numbers=("NCHW", "OIHW", "NCHW"))
    conv_out = conv_out + conv_b[None, :, None, None]
    emb = jax.nn.silu(t) @ lin_w.T + lin_b                   # (B, dim)
    return conv_out + emb[:, :, None, None]


if __name__ == "__main__":
    # Small shapes consistent with the module.
    B, C, H, W = 2, 4, 16, 16
    patch_size = 4
    dim = 32
    emb_dim = 32

    key = jax.random.PRNGKey(0)
    kx, kt, kw1, kb1, kw2, kb2 = jax.random.split(key, 6)

    x = jax.random.normal(kx, (B, C, H, W), dtype=jnp.float32)
    t = jax.random.normal(kt, (B, emb_dim), dtype=jnp.float32)

    # Deterministic synthetic parameters (shapes follow the nn.Module __init__).
    conv_w = jax.random.normal(kw1, (dim, C, patch_size, patch_size), jnp.float32) * 0.05
    conv_b = jax.random.normal(kb1, (dim,), jnp.float32) * 0.05
    lin_w = jax.random.normal(kw2, (dim, emb_dim), jnp.float32) * 0.05   # torch (out, in)
    lin_b = jax.random.normal(kb2, (dim,), jnp.float32) * 0.05

    out = patch_embedding_forward(x, t, conv_w, conv_b, lin_w, lin_b, patch_size)
    out = jax.block_until_ready(out)

    ref = _reference_forward(x, t, conv_w, conv_b, lin_w, lin_b, patch_size)
    assert out.shape == ref.shape == (B, dim, H // patch_size, W // patch_size)
    # Tolerance accounts for bf16 MXU inputs (f32 accumulation); error ~1e-3 here.
    assert jnp.allclose(out, ref, atol=2e-2, rtol=2e-2), "mismatch vs reference"

    print("KERNEL_OK")
</pallas_src>

<mosaic_0001>
module attributes {stable_mosaic.version = 11 : i64} {
  func.func @_patch_embed_kernel(%arg0: i32, %arg1: i32, %arg2: memref<32x64xbf16, #tpu.memory_space<vmem>>, %arg3: memref<1x32x1xf32, #tpu.memory_space<vmem>>, %arg4: memref<1x64x16xbf16, #tpu.memory_space<vmem>>, %arg5: memref<1x32x16xf32, #tpu.memory_space<vmem>>) attributes {dimension_semantics = [#tpu.dimension_semantics<parallel>, #tpu.dimension_semantics<parallel>], iteration_bounds = array<i64: 2, 1>, scalar_prefetch = 0 : i64, scratch_operands = 0 : i64, tpu.core_type = #tpu.core_type<tc>, window_params = [{pipeline_mode = #tpu.pipeline_mode<synchronous>, transform_indices = @transform_0, window_bounds = array<i64: 32, 64>}, {transform_indices = @transform_1, window_bounds = array<i64: 1, 32, 1>}, {transform_indices = @transform_2, window_bounds = array<i64: 1, 64, 16>}, {transform_indices = @transform_3, window_bounds = array<i64: 1, 32, 16>}]} {
    %c0 = arith.constant 0 : index
    %c0_0 = arith.constant 0 : index
    %0 = vector.load %arg2[%c0, %c0_0] : memref<32x64xbf16, #tpu.memory_space<vmem>>, vector<32x64xbf16>
    %c0_1 = arith.constant 0 : index
    %c0_2 = arith.constant 0 : index
    %c0_3 = arith.constant 0 : index
    %1 = vector.load %arg4[%c0_1, %c0_2, %c0_3] : memref<1x64x16xbf16, #tpu.memory_space<vmem>>, vector<1x64x16xbf16>
    %2 = vector.shape_cast %1 : vector<1x64x16xbf16> to vector<64x16xbf16>
    %cst = arith.constant dense<0.000000e+00> : vector<32x16xf32>
    %3 = tpu.matmul %0, %2, %cst {dimension_numbers = #tpu.dot_dimension_numbers<[1], [0], [0], [1], [0, 0, 1, 1], [], []>} : vector<32x64xbf16>, vector<64x16xbf16>, vector<32x16xf32> -> vector<32x16xf32>
    %c0_4 = arith.constant 0 : index
    %c0_5 = arith.constant 0 : index
    %c0_6 = arith.constant 0 : index
    %4 = vector.load %arg3[%c0_4, %c0_5, %c0_6] : memref<1x32x1xf32, #tpu.memory_space<vmem>>, vector<1x32x1xf32>
    %5 = vector.shape_cast %4 : vector<1x32x1xf32> to vector<32x1xf32>
    %6 = vector.broadcast %5 : vector<32x1xf32> to vector<32x16xf32>
    %7 = arith.addf %3, %6 : vector<32x16xf32>
    %c0_7 = arith.constant 0 : index
    %c0_8 = arith.constant 0 : index
    %c0_9 = arith.constant 0 : index
    %8 = vector.load %arg5[%c0_7, %c0_8, %c0_9] : memref<1x32x16xf32, #tpu.memory_space<vmem>>, vector<1x32x16xf32>
    %9 = vector.shape_cast %8 : vector<1x32x16xf32> to vector<32x16xf32>
    %10 = vector.shape_cast %7 : vector<32x16xf32> to vector<1x32x16xf32>
    tpu.vector_store %arg5[%c0_7, %c0_8, %c0_9], %10 {strides = array<i32>} : memref<1x32x16xf32, #tpu.memory_space<vmem>>, vector<1x32x16xf32>,
    return
  }
  func.func @transform_0(%arg0: i32, %arg1: i32) -> (i32, i32) {
    %c0_i32 = arith.constant 0 : i32
    %c0_i32_0 = arith.constant 0 : i32
    %c0_i32_1 = arith.constant 0 : i32
    return %c0_i32, %c0_i32_0 : i32, i32
  }
  func.func @transform_1(%arg0: i32, %arg1: i32) -> (i32, i32, i32) {
    %c0_i32 = arith.constant 0 : i32
    %c0_i32_0 = arith.constant 0 : i32
    %c0_i32_1 = arith.constant 0 : i32
    return %arg0, %c0_i32, %c0_i32_0 : i32, i32, i32
  }
  func.func @transform_2(%arg0: i32, %arg1: i32) -> (i32, i32, i32) {
    %c0_i32 = arith.constant 0 : i32
    %c0_i32_0 = arith.constant 0 : i32
    return %arg0, %c0_i32, %arg1 : i32, i32, i32
  }
  func.func @transform_3(%arg0: i32, %arg1: i32) -> (i32, i32, i32) {
    %c0_i32 = arith.constant 0 : i32
    %c0_i32_0 = arith.constant 0 : i32
    return %arg0, %c0_i32, %arg1 : i32, i32, i32
  }
}

</mosaic_0001>

<bundles_post_ra>
// kernel: tpu_custom_call.1
= control target key start
LH: loop header
LB: loop body
LE: loop exit
PB: predicated region body
PF: predicated region fallthrough
CT: control target
= control target key end

     0   :  { %s569_s12 = smov 0   ;;  %s571_s13 = smov 0   ;;  %s613_s0 = inlined_call_operand.vmem [shape: bf16[32,64], index: 0, kind: input, shape index: {}]   ;;  %s614_s1 = inlined_call_operand.vmem [shape: f32[2,32,1], index: 1, kind: input, shape index: {}]   ;;  %s615_s2 = inlined_call_operand.vmem [shape: bf16[2,64,16], index: 2, kind: input, shape index: {}]   ;;  %s616_s3 = inlined_call_operand.vmem [shape: f32[2,32,16], index: 3, kind: output, shape index: {}]  }
   0x1   :  { %s573_s14 = smov 0  }
   0x2 LB: > { %s25_s15 = sadd.s32 1, %s542_s13  ;;  %p453_p0 = scmp.ge.s32.totalorder %s546_s14, 1  ;;  %s546_s14 = sphi %s573_s14, %s13_s14   ;;  %s542_s13 = sphi %s571_s13, %s618_s13   ;;  %s538_s12 = sphi %s569_s12, %s617_s12  }
   0x3   : > { %p27_p1 = scmp.ge.s32.totalorder %s25_s15, 2  ;;  %p166_p2 = scmp.lt.s32.totalorder %s546_s14, 3 }
   0x5   : > { %s620_s15 = smov (%p27_p1, %s25_s15), 0  ;;  %p167_p3 = pnand %p453_p0, %p166_p2 }
   0x6   : > { %p201_p4 = scmp.lt.s32.totalorder (!%p167_p3), %s538_s12, 1  ;;  %v522_v0 = vld [vmem:[%s613_s0] sm:$0xff] (!%p167_p3)   ;;  %vm293_vm0 = vcmask (!%p167_p3), 523264   ;;  %v548_v1 = vmov (!%p167_p3), 0   ;;  %v523_v10 = vld [vmem:[%s613_s0 + $0x8] sm:$0xff] (!%p167_p3)   ;;  %vm349_vm1 = vcmask (!%p167_p3), 130048  }
   0x7   : > { %170 = sbr.rel (%p167_p3) target bundleno = 252 (0xfc), region = 32  ;;  %487 = vmatprep.mubr.msk.bf16.mxu0 (!%p167_p3), %vm293_vm0, %v522_v0  ;;  %517 = vset.pattern.permute.xlu1 (!%p167_p3), %v548_v1 }
   0x8   : > { %516 = vset.pattern.permute.xlu0 (!%p167_p3), %v548_v1 }
   0xe   : > { %s622_s12 = smov (!%p201_p4, %s538_s12), 1 }
   0xf   : > { %s470_s18 = sshll.u32 %s622_s12, 5 }
  0x10   : > { %s213_s21 = scalar_lea.vmem %s615_s2, %s470_s18  ;;  %s205_s24 = scalar_lea.vmem %s614_s1, %s470_s18 }
  0x11   : > { %v518_v2 = vld [vmem:[%s213_s21] sm:$0xff]   ;;  %v519_v3 = vld [vmem:[%s213_s21 + $0x8] sm:$0xff]   ;;  %v520_v4 = vld [vmem:[%s213_s21 + $0x10] sm:$0xff]   ;;  %s221_s29 = scalar_lea.vmem %s616_s3, %s470_s18 }
  0x12   : > { %479 = vmatprep.subr.bf16.mxu0 %v518_v2  ;;  %v237_v5 = vld [vmem:[%s205_s24 + $0x10] sm:$0xff]  ;;  %v235_v6 = vld [vmem:[%s205_s24] sm:$0xff]  ;;  %v238_v7 = vld [vmem:[%s205_s24 + $0x18] sm:$0xff] }
  0x13   : > { %480 = vmatpush3.bf16.msra.mxu0 %v518_v2  ;;  %251 = vperm.xlu1 %517, %v237_v5   ;;  %v236_v8 = vld [vmem:[%s205_s24 + $0x8] sm:$0xff]  ;;  %v521_v9 = vld [vmem:[%s213_s21 + $0x18] sm:$0xff]  }
  0x14   : > { %481 = vmatprep.subr.bf16.mxu0 %v519_v3  ;;  %241 = vperm.xlu0 %516, %v235_v6  }
  0x17   : > { %482 = vmatpush3.bf16.msra.mxu0 %v519_v3  ;;  %256 = vperm.xlu1 %517, %v238_v7  }
  0x18   : > { %483 = vmatprep.subr.bf16.mxu0 %v520_v4  ;;  %246 = vperm.xlu0 %516, %v236_v8  }
  0x1b   : > { %484 = vmatpush3.bf16.msra.mxu0 %v520_v4 }
  0x1c   : > { %485 = vmatprep.subr.bf16.mxu0 %v521_v9 }
  0x1f   : > { %486 = vmatpush3.bf16.msra.mxu0 %v521_v9 }
  0x22   : > { %488 = vmatmul.mubr.msk.bf16.vlgmr.msra.gmra.mrb[0].mxu0 %vm293_vm0, %v523_v10 }
  0x92   : > { %v252_v11 = vpop.permute.xlu1 %251 }
  0x93   : > { %v242_v12 = vpop.permute.xlu0 %241 }
  0x96   : > { %v257_v16 = vpop.permute.xlu1 %256 }
  0x97   : > { %v247_v19 = vpop.permute.xlu0 %246 }
  0xf5   : > { %v489_v13 = vpop.f32.mrb[0].mxu0 }
  0xf6   : > { %v343_v14 = vadd.f32 %v489_v13, %v252_v11  ;;  %v334_v15 = vpop.f32.mrb[1].mxu0 }
  0xf7   : > { %v335_v17 = vadd.f32 %v334_v15, %v242_v12  ;;  %v490_v18 = vpop.f32.mrb[2].mxu0 }
  0xf8   : > { %352 = vst.msk [vmem:[%s221_s29 + $0x10] sm:$0xff] %vm349_vm1, %v343_v14  ;;  %v346_v20 = vadd.f32 %v490_v18, %v257_v16  ;;  %v337_v21 = vpop.f32.mrb[3].mxu0 }
  0xf9   : > { %350 = vst.msk [vmem:[%s221_s29] sm:$0xff] %vm349_vm1, %v335_v17  ;;  %v338_v22 = vadd.f32 %v337_v21, %v247_v19 }
  0xfa   : > { %353 = vst.msk [vmem:[%s221_s29 + $0x18] sm:$0xff] %vm349_vm1, %v346_v20 }
  0xfb   : > { %351 = vst.msk [vmem:[%s221_s29 + $0x8] sm:$0xff] %vm349_vm1, %v338_v22 }
  0xfc PF: > { %s13_s14 = sadd.s32 1, %s546_s14   ;;  %s617_s12 = smov %s542_s13 }
  0xfd   : > { %p10_p5 = scmp.ge.s32.totalorder %s13_s14, 4   ;;  %s618_s13 = smov %s620_s15 }
  0xff   :  { %12 = sbr.rel (!%p10_p5) target bundleno = 2 (0x2), region = 65 }

</bundles_post_ra>
